<compile_context>
chip_gen: v6e
topology: v6e:2x2x1
jax: 0.10.0
libtpu: 0.0.40
codegen_flags: <defaults>
</compile_context>

<pallas_src>
import jax
import jax.numpy as jnp
from jax.experimental import pallas as pl
from jax.experimental.pallas import tpu as pltpu

_LANES = 128            # vreg lane width / last-dim tiling unit
_SUBLANES = 8           # sublane tiling unit for f32
_MAX_TILE_ROWS = 8192   # 8192 x 128 f32 = 4 MiB per buffer, 8 MiB double-buffered


def _fill_kernel(fill_ref, o_ref):
    # fill_ref: SMEM (1,) holding exp(variance * 10), precomputed in the wrapper.
    # o_ref:    VMEM (tile_rows, 128) output tile.
    # Pure splat: scalar -> full-lane stores; no transcendental in the kernel.
    o_ref[...] = jnp.full(o_ref.shape, fill_ref[0], dtype=o_ref.dtype)


def single_variance_forward(x, variance):
    """JAX/Pallas equivalent of SingleVarianceNetwork.forward.

    Args:
      x: array whose leading dim gives the batch size N (contents unused).
      variance: scalar parameter (the registered nn.Parameter).

    Returns:
      (N, 1) float32 array, every element equal to exp(variance * 10.0).
    """
    n = x.shape[0]

    # Hoisted scalar transcendental (one XLA scalar op, negligible).
    fill = jnp.exp(jnp.asarray(variance, jnp.float32) * 10.0).reshape((1,))

    if n == 0:  # empty batch: nothing to fill, avoid a zero-sized grid.
        return jnp.zeros((0, 1), jnp.float32)

    # Lane-dense view: N scalars -> (rows, 128) slab, rows padded so the
    # (tile_rows, 128) BlockSpec divides the slab exactly (8,128 constraint,
    # unmasked full-lane stores).
    rows_needed = -(-n // _LANES)                               # ceil(N / 128)
    tile_rows = min(_MAX_TILE_ROWS,
                    -(-rows_needed // _SUBLANES) * _SUBLANES)   # multiple of 8
    num_tiles = -(-rows_needed // tile_rows)                    # >= 2 for big N
    rows_total = num_tiles * tile_rows

    slab = pl.pallas_call(
        _fill_kernel,
        out_shape=jax.ShapeDtypeStruct((rows_total, _LANES), jnp.float32),
        grid=(num_tiles,),
        in_specs=[pl.BlockSpec(memory_space=pltpu.MemorySpace.SMEM)],
        out_specs=pl.BlockSpec((tile_rows, _LANES), lambda i: (i, 0)),
        compiler_params=pltpu.CompilerParams(
            dimension_semantics=("parallel",)),
        cost_estimate=pl.CostEstimate(
            flops=0, transcendentals=0,
            bytes_accessed=rows_total * _LANES * 4),
    )(fill)

    # Back to the module's (N, 1) contract (single reshape + slice; padding
    # rows hold the same constant so the slice is safe).  Prefer consuming the
    # slab / an (N,) vector directly when the caller allows it.
    return slab.reshape(-1)[:n].reshape(n, 1)


if __name__ == "__main__":
    key = jax.random.PRNGKey(0)
    # Small example: N=8 query points with 3 coordinates each (contents unused).
    x = jax.random.normal(key, (8, 3), dtype=jnp.float32)

    # Deterministic parameter init, matching the module config init_val = 0.3.
    init_val = 0.3
    variance = jnp.asarray(init_val, dtype=jnp.float32)

    out = jax.block_until_ready(single_variance_forward(x, variance))

    # Reference check (pure JAX) of the forward semantics.
    ref = jnp.ones((x.shape[0], 1), jnp.float32) * jnp.exp(variance * 10.0)
    assert out.shape == (8, 1), out.shape
    assert out.dtype == jnp.float32, out.dtype
    assert jnp.allclose(out, ref, rtol=1e-6, atol=1e-6), (out, ref)

    # Larger, non-multiple-of-128 batch: exercises the tiled / padded path.
    n_big = 5000
    x_big = jnp.zeros((n_big, 3), jnp.float32)
    out_big = jax.block_until_ready(single_variance_forward(x_big, variance))
    ref_big = jnp.ones((n_big, 1), jnp.float32) * jnp.exp(variance * 10.0)
    assert out_big.shape == (n_big, 1), out_big.shape
    assert jnp.allclose(out_big, ref_big, rtol=1e-6, atol=1e-6)

    # Empty batch path (no pallas_call issued).
    out_empty = jax.block_until_ready(
        single_variance_forward(jnp.zeros((0, 3), jnp.float32), variance))
    assert out_empty.shape == (0, 1), out_empty.shape

    print("KERNEL_OK")
</pallas_src>

<mosaic_0001>
module attributes {stable_mosaic.version = 11 : i64} {
  func.func @_fill_kernel(%arg0: i32, %arg1: memref<1xf32, #tpu.memory_space<smem>>, %arg2: memref<8x128xf32, #tpu.memory_space<vmem>>) attributes {dimension_semantics = [#tpu.dimension_semantics<parallel>], iteration_bounds = array<i64: 1>, scalar_prefetch = 0 : i64, scratch_operands = 0 : i64, tpu.core_type = #tpu.core_type<tc>, window_params = [{transform_indices = @transform_0, window_bounds = array<i64: 1>}, {transform_indices = @transform_1, window_bounds = array<i64: 8, 128>}]} {
    %c0 = arith.constant 0 : index
    %0 = memref.load %arg1[%c0] : memref<1xf32, #tpu.memory_space<smem>>
    %1 = vector.broadcast %0 : f32 to vector<8x128xf32>
    %c0_0 = arith.constant 0 : index
    %c0_1 = arith.constant 0 : index
    %2 = vector.load %arg2[%c0_0, %c0_1] : memref<8x128xf32, #tpu.memory_space<vmem>>, vector<8x128xf32>
    tpu.vector_store %arg2[%c0_0, %c0_1], %1 {strides = array<i32>} : memref<8x128xf32, #tpu.memory_space<vmem>>, vector<8x128xf32>,
    return
  }
  func.func @transform_0(%arg0: i32) -> i32 {
    %c0_i32 = arith.constant 0 : i32
    %c0_i32_0 = arith.constant 0 : i32
    return %c0_i32 : i32
  }
  func.func @transform_1(%arg0: i32) -> (i32, i32) {
    %c0_i32 = arith.constant 0 : i32
    %c0_i32_0 = arith.constant 0 : i32
    return %arg0, %c0_i32 : i32, i32
  }
}

</mosaic_0001>

<bundles_post_ra>
// kernel: tpu_custom_call.1
= control target key start
LH: loop header
LB: loop body
LE: loop exit
PB: predicated region body
PF: predicated region fallthrough
CT: control target
= control target key end

     0   :  { %s67_s0 = inlined_call_operand.<no memory space> [shape: f32[1], index: 0, kind: input, shape index: {}]   ;;  %s68_s1 = inlined_call_operand.hbm [shape: f32[8,128], index: 1, kind: output, shape index: {}]  }
   0x1   :  { %v11_v0 = vstv %s67_s0 }
   0x2   :  { %7 = vsyncpa [#allocation4], 0  ;;  %12 = vst [vmem:[#allocation3] sm:$0xff] %v11_v0  ;;  %s50_s8 = smov [#allocation3]  }
   0x3   :  { %s19_s9 = sshll.u32 %s50_s8, 4  ;;  %s20_s9 = int_to_ptr.vmem [resolvable:$true] %s19_s9 }
   0x4   :  { %s28_s10 = scalar_lea.vmem %s20_s9, 128  ;;  %p33_p1 = scmp.lt.s32.totalorder %s20_s9, %s20_s9 }
   0x5   :  { %p29_p0 = scmp.ne.s32.totalorder %s20_s9, %s28_s10  ;;  %p34_p2 = scmp.lt.s32.totalorder %s28_s10, %s28_s10 }
   0x7   :  { %p35_p3 = por %p34_p2, %p33_p1 }
   0x9   :  { %p36_p4 = pnand %p35_p3, %p29_p0 }
   0xb   :  { %39 = shalt.err (!%p36_p4)
}
   0xc   :  { %22 = dma.vmem_to_hbm [thread:$0]  %s20_s9, 128, %s68_s1, [#allocation4]  }
   0xd   :  { %48 = dma.done.wait [#allocation4], 128  }
   0xe   :  { %49 = vsyncadd [#allocation4], 4294967168 }
   0xf   :  { %26 = vsyncpa [#allocation4], 1 }

</bundles_post_ra>
